<compile_context>
chip_gen: v5e
topology: v5e:2x2
jax: 0.10.0
libtpu: 0.0.40
codegen_flags: <defaults>
</compile_context>

<pallas_src>
import functools
import math

import jax
import jax.numpy as jnp
from jax import lax
from jax.experimental import pallas as pl
from jax.experimental.pallas import tpu as pltpu


def _round_up(x: int, m: int) -> int:
    return ((x + m - 1) // m) * m


def _cdiv(a: int, b: int) -> int:
    return -(-a // b)


def _pick_block(size: int, target: int, align: int) -> int:
    """Largest align-multiple block <= target that minimizes last-block waste."""
    target = max(align, (target // align) * align)
    if size <= target:
        return _round_up(size, align)
    nblk = _cdiv(size, target)
    return min(target, _round_up(_cdiv(size, nblk), align))


def _flash_attention_kernel(q_ref, k_ref, v_ref, o_ref,
                            qs_sc, m_sc, l_sc, acc_sc,
                            *, scale: float, s_k: int, block_k: int,
                            compute_dtype):
    # q_ref: (tq, d)   k_ref: (tk, d)   v_ref: (tk, d_v)   o_ref: (tq, d_v)
    # qs_sc: (tq, d) compute_dtype      m_sc/l_sc: (tq, 1) f32   acc_sc: (tq, d_v) f32
    ki = pl.program_id(2)
    nk = pl.num_programs(2)

    @pl.when(ki == 0)
    def _init():
        m_sc[...] = jnp.full(m_sc.shape, -jnp.inf, dtype=jnp.float32)
        l_sc[...] = jnp.zeros(l_sc.shape, dtype=jnp.float32)
        acc_sc[...] = jnp.zeros(acc_sc.shape, dtype=jnp.float32)
        # Hoisted: scale (and optional bf16 cast) of Q once per (batch, q-block),
        # not once per kv step.
        qs_sc[...] = (q_ref[...].astype(jnp.float32)
                      * jnp.float32(scale)).astype(qs_sc.dtype)

    k = k_ref[...].astype(compute_dtype)
    v = v_ref[...].astype(compute_dtype)

    # scores = (Q/sqrt(d)) @ K^T, contracting on d of both operands (no K transpose).
    s = lax.dot_general(qs_sc[...], k,
                        dimension_numbers=(((1,), (1,)), ((), ())),
                        preferred_element_type=jnp.float32)          # (tq, tk) f32

    def flash_update(s_blk, v_blk):
        m_prev = m_sc[...]
        m_new = jnp.maximum(m_prev, jnp.max(s_blk, axis=-1, keepdims=True))
        alpha = jnp.exp(m_prev - m_new)
        p = jnp.exp(s_blk - m_new)                                    # (tq, tk)
        l_sc[...] = alpha * l_sc[...] + jnp.sum(p, axis=-1, keepdims=True)
        acc_sc[...] = alpha * acc_sc[...] + lax.dot_general(
            p.astype(v_blk.dtype), v_blk,
            dimension_numbers=(((1,), (0,)), ((), ())),
            preferred_element_type=jnp.float32)
        m_sc[...] = m_new

    if s_k % block_k != 0:
        # Ragged kv tail: mask only on the LAST kv block, so the mask's VALU
        # work never touches the hot inner loop.
        @pl.when(ki < nk - 1)
        def _hot():
            flash_update(s, v)

        @pl.when(ki == nk - 1)
        def _tail():
            col = ki * block_k + lax.broadcasted_iota(jnp.int32, s.shape, 1)
            s_m = jnp.where(col < s_k, s, -jnp.inf)
            # Out-of-bounds V rows hold unspecified VMEM contents; zero them so
            # p(==0) * garbage can never produce NaN/Inf.
            row = ki * block_k + lax.broadcasted_iota(jnp.int32, v.shape, 0)
            v_m = jnp.where(row < s_k, v, jnp.zeros_like(v))
            flash_update(s_m, v_m)
    else:
        flash_update(s, v)

    @pl.when(ki == nk - 1)
    def _finalize():
        # Normalize the (tq, d_v) accumulator once per output tile (not the
        # (tq, tk) weights every step).  Exact reciprocal: runs once, on (tq, 1).
        inv_l = pl.reciprocal(l_sc[...], approx=False)
        o_ref[...] = (acc_sc[...] * inv_l).astype(o_ref.dtype)


def dot_product_attention(keys, queries, values, dropout: float = 0.0, *,
                          block_q: int = 512, block_k: int = 512,
                          use_bf16_matmul: bool = True,
                          core_parallel_batch: bool = False):
    """Pallas TPU flash-attention equivalent of DotProductAttention.forward.

    keys:    (B, S_k, d)
    queries: (B, S_q, d)
    values:  (B, S_k, d_v)
    returns: (B, S_q, d_v)
    """
    # TODO(synk): dropout p > 0 (training) would need pltpu.prng_seed /
    #             pltpu.prng_random_bits over the attention weights; p == 0 is identity.
    del dropout

    B, S_q, d = queries.shape
    _, S_k, d_v = values.shape
    assert keys.shape == (B, S_k, d)

    in_dtype = queries.dtype
    itemsize = queries.dtype.itemsize
    scale = 1.0 / math.sqrt(d)

    # bf16-in / f32-acc MXU path for f32 inputs (v5e/v6e have no fast native f32
    # MXU path).  Accumulators / softmax stay f32.  Set use_bf16_matmul=False
    # when bit-closeness to the f32 reference matters.
    if use_bf16_matmul and in_dtype == jnp.float32:
        compute_dtype = jnp.bfloat16
    else:
        compute_dtype = in_dtype

    # Sublane tile of the *stored* dtype: 8 for f32, 16 for bf16, 32 for int8/fp8.
    sublane = max(8, 32 // itemsize)

    # Tile sizes: as large as the targets allow, sized to minimize last-block
    # waste.  No wrapper-side padding: head dims use the full array dim as the
    # block dim; ragged sequence tails are handled in-kernel.
    # (v7x has 64 MiB physical VMEM vs 128 MiB on v5e/v6e: keep block_q/block_k
    #  at the defaults there; v5e/v6e can go larger.)
    tq = _pick_block(S_q, block_q, sublane)
    tk = _pick_block(S_k, block_k, 128 if block_k >= 128 else sublane)

    grid = (B, _cdiv(S_q, tq), _cdiv(S_k, tk))

    kernel = functools.partial(_flash_attention_kernel, scale=scale,
                               s_k=S_k, block_k=tk, compute_dtype=compute_dtype)

    # Batch / q-block axes are independent; the kv axis is the online-softmax
    # reduction and stays sequential / last.  Plain "parallel" does not change
    # TensorCore sharding on v7x — set core_parallel_batch=True there to shard
    # the batch axis across its 2 TCs.
    batch_sem = pltpu.CORE_PARALLEL if core_parallel_batch else pltpu.PARALLEL

    cost = pl.CostEstimate(
        flops=2 * B * S_q * S_k * (d + d_v),
        transcendentals=B * S_q * S_k,
        bytes_accessed=(queries.size + keys.size + values.size
                        + B * S_q * d_v) * itemsize,
    )

    return pl.pallas_call(
        kernel,
        out_shape=jax.ShapeDtypeStruct((B, S_q, d_v), in_dtype),
        grid_spec=pltpu.PrefetchScalarGridSpec(
            num_scalar_prefetch=0,
            grid=grid,
            in_specs=[
                # Leading batch dim squeezed -> kernel sees 2-D tiles.  If
                # profiling on v5e shows exposed K/V DMA, add
                # pipeline_mode=pl.Buffered(3) to the K / V specs.
                pl.BlockSpec((None, tq, d), lambda b, qi, ki: (b, qi, 0)),    # Q
                pl.BlockSpec((None, tk, d), lambda b, qi, ki: (b, ki, 0)),    # K
                pl.BlockSpec((None, tk, d_v), lambda b, qi, ki: (b, ki, 0)),  # V
            ],
            out_specs=pl.BlockSpec((None, tq, d_v), lambda b, qi, ki: (b, qi, 0)),
            scratch_shapes=[
                pltpu.VMEM((tq, d), compute_dtype),    # pre-scaled / pre-cast Q
                pltpu.VMEM((tq, 1), jnp.float32),      # running max  m
                pltpu.VMEM((tq, 1), jnp.float32),      # running sum  l
                pltpu.VMEM((tq, d_v), jnp.float32),    # un-normalized P@V acc
            ],
        ),
        compiler_params=pltpu.CompilerParams(
            dimension_semantics=(batch_sem, pltpu.PARALLEL, pltpu.ARBITRARY),
            # Comfortably within v7x's 64 MiB physical VMEM; v5e/v6e (128 MiB)
            # can raise this if larger tiles are wanted.
            vmem_limit_bytes=48 * 1024 * 1024,
        ),
        cost_estimate=cost,
    )(queries, keys, values)


def _reference(keys, queries, values):
    d = queries.shape[-1]
    scores = jnp.einsum("bqd,bkd->bqk", queries, keys) / math.sqrt(d)
    weights = jax.nn.softmax(scores, axis=-1)
    return jnp.einsum("bqk,bkv->bqv", weights, values)


if __name__ == "__main__":
    # Test 1: the module's small regime (single block), exact f32 matmul path.
    k1, k2, k3 = jax.random.split(jax.random.PRNGKey(0), 3)
    B, S_q, S_k, d, d_v = 2, 8, 8, 32, 32
    q1 = jax.random.normal(k1, (B, S_q, d), dtype=jnp.float32)
    kk1 = jax.random.normal(k2, (B, S_k, d), dtype=jnp.float32)
    v1 = jax.random.normal(k3, (B, S_k, d_v), dtype=jnp.float32)

    out1 = jax.block_until_ready(
        dot_product_attention(kk1, q1, v1, dropout=0.0, use_bf16_matmul=False))
    ref1 = _reference(kk1, q1, v1)
    assert out1.shape == (B, S_q, d_v)
    assert jnp.allclose(out1, ref1, atol=1e-4, rtol=1e-4), "test1 mismatch"

    # Test 2: multi-block online softmax, ragged q- and kv-tails (in-kernel
    # masking, dropped partial output rows), non-128 head dims, exact f32 path.
    k4, k5, k6 = jax.random.split(jax.random.PRNGKey(1), 3)
    B2, Sq2, Sk2, d2, dv2 = 2, 40, 70, 32, 48
    q2 = jax.random.normal(k4, (B2, Sq2, d2), dtype=jnp.float32)
    kk2 = jax.random.normal(k5, (B2, Sk2, d2), dtype=jnp.float32)
    v2 = jax.random.normal(k6, (B2, Sk2, dv2), dtype=jnp.float32)

    out2 = jax.block_until_ready(
        dot_product_attention(kk2, q2, v2, dropout=0.0,
                              block_q=16, block_k=24, use_bf16_matmul=False))
    ref2 = _reference(kk2, q2, v2)
    assert out2.shape == (B2, Sq2, dv2)
    assert jnp.allclose(out2, ref2, atol=1e-4, rtol=1e-4), "test2 mismatch"

    # Test 3: performance-default path (bf16-in / f32-acc MXU) on f32 inputs.
    k7, k8, k9 = jax.random.split(jax.random.PRNGKey(2), 3)
    B3, Sq3, Sk3, d3, dv3 = 2, 128, 128, 64, 64
    q3 = jax.random.normal(k7, (B3, Sq3, d3), dtype=jnp.float32)
    kk3 = jax.random.normal(k8, (B3, Sk3, d3), dtype=jnp.float32)
    v3 = jax.random.normal(k9, (B3, Sk3, dv3), dtype=jnp.float32)

    out3 = jax.block_until_ready(dot_product_attention(kk3, q3, v3, dropout=0.0))
    ref3 = _reference(kk3, q3, v3)
    assert out3.shape == (B3, Sq3, dv3)
    assert jnp.allclose(out3, ref3, atol=5e-2, rtol=5e-2), "test3 mismatch"

    print("KERNEL_OK")
</pallas_src>

<mosaic_0001>
module attributes {stable_mosaic.version = 11 : i64} {
  func.func @_flash_attention_kernel(%arg0: i32, %arg1: i32, %arg2: i32, %arg3: memref<1x8x32xf32, #tpu.memory_space<vmem>>, %arg4: memref<1x128x32xf32, #tpu.memory_space<vmem>>, %arg5: memref<1x128x32xf32, #tpu.memory_space<vmem>>, %arg6: memref<1x8x32xf32, #tpu.memory_space<vmem>>, %arg7: memref<8x32xf32, #tpu.memory_space<vmem>>, %arg8: memref<8x1xf32, #tpu.memory_space<vmem>>, %arg9: memref<8x1xf32, #tpu.memory_space<vmem>>, %arg10: memref<8x32xf32, #tpu.memory_space<vmem>>) attributes {dimension_semantics = [#tpu.dimension_semantics<parallel>, #tpu.dimension_semantics<parallel>, #tpu.dimension_semantics<arbitrary>], iteration_bounds = array<i64: 2, 1, 1>, scalar_prefetch = 0 : i64, scratch_operands = 4 : i64, tpu.core_type = #tpu.core_type<tc>, window_params = [{transform_indices = @transform_0, window_bounds = array<i64: 1, 8, 32>}, {transform_indices = @transform_1, window_bounds = array<i64: 1, 128, 32>}, {transform_indices = @transform_2, window_bounds = array<i64: 1, 128, 32>}, {transform_indices = @transform_3, window_bounds = array<i64: 1, 8, 32>}]} {
    %c0_i32 = arith.constant 0 : i32
    %0 = arith.cmpi eq, %arg2, %c0_i32 : i32
    %1 = arith.extui %0 : i1 to i32
    %c0_i32_0 = arith.constant 0 : i32
    %2 = arith.cmpi ne, %1, %c0_i32_0 : i32
    scf.if %2 {
      %cst_14 = arith.constant 0xFF800000 : f32
      %18 = vector.broadcast %cst_14 : f32 to vector<8x1xf32>
      %c0_15 = arith.constant 0 : index
      %c0_16 = arith.constant 0 : index
      %19 = vector.load %arg8[%c0_15, %c0_16] : memref<8x1xf32, #tpu.memory_space<vmem>>, vector<8x1xf32>
      tpu.vector_store %arg8[%c0_15, %c0_16], %18 {strides = array<i32>} : memref<8x1xf32, #tpu.memory_space<vmem>>, vector<8x1xf32>,
      %cst_17 = arith.constant 0.000000e+00 : f32
      %20 = vector.broadcast %cst_17 : f32 to vector<8x1xf32>
      %c0_18 = arith.constant 0 : index
      %c0_19 = arith.constant 0 : index
      %21 = vector.load %arg9[%c0_18, %c0_19] : memref<8x1xf32, #tpu.memory_space<vmem>>, vector<8x1xf32>
      tpu.vector_store %arg9[%c0_18, %c0_19], %20 {strides = array<i32>} : memref<8x1xf32, #tpu.memory_space<vmem>>, vector<8x1xf32>,
      %cst_20 = arith.constant 0.000000e+00 : f32
      %22 = vector.broadcast %cst_20 : f32 to vector<8x32xf32>
      %c0_21 = arith.constant 0 : index
      %c0_22 = arith.constant 0 : index
      %23 = vector.load %arg10[%c0_21, %c0_22] : memref<8x32xf32, #tpu.memory_space<vmem>>, vector<8x32xf32>
      tpu.vector_store %arg10[%c0_21, %c0_22], %22 {strides = array<i32>} : memref<8x32xf32, #tpu.memory_space<vmem>>, vector<8x32xf32>,
      %c0_23 = arith.constant 0 : index
      %c0_24 = arith.constant 0 : index
      %c0_25 = arith.constant 0 : index
      %24 = vector.load %arg3[%c0_23, %c0_24, %c0_25] : memref<1x8x32xf32, #tpu.memory_space<vmem>>, vector<1x8x32xf32>
      %25 = vector.shape_cast %24 : vector<1x8x32xf32> to vector<8x32xf32>
      %cst_26 = arith.constant 0.176776692 : f32
      %26 = vector.broadcast %cst_26 : f32 to vector<8x32xf32>
      %27 = arith.mulf %25, %26 : vector<8x32xf32>
      %c0_27 = arith.constant 0 : index
      %c0_28 = arith.constant 0 : index
      %28 = vector.load %arg7[%c0_27, %c0_28] : memref<8x32xf32, #tpu.memory_space<vmem>>, vector<8x32xf32>
      tpu.vector_store %arg7[%c0_27, %c0_28], %27 {strides = array<i32>} : memref<8x32xf32, #tpu.memory_space<vmem>>, vector<8x32xf32>,
    } else {
    }
    %c0 = arith.constant 0 : index
    %c0_1 = arith.constant 0 : index
    %c0_2 = arith.constant 0 : index
    %3 = vector.load %arg4[%c0, %c0_1, %c0_2] : memref<1x128x32xf32, #tpu.memory_space<vmem>>, vector<1x128x32xf32>
    %4 = vector.shape_cast %3 : vector<1x128x32xf32> to vector<128x32xf32>
    %c0_3 = arith.constant 0 : index
    %c0_4 = arith.constant 0 : index
    %c0_5 = arith.constant 0 : index
    %5 = vector.load %arg5[%c0_3, %c0_4, %c0_5] : memref<1x128x32xf32, #tpu.memory_space<vmem>>, vector<1x128x32xf32>
    %6 = vector.shape_cast %5 : vector<1x128x32xf32> to vector<128x32xf32>
    %c0_6 = arith.constant 0 : index
    %c0_7 = arith.constant 0 : index
    %7 = vector.load %arg7[%c0_6, %c0_7] : memref<8x32xf32, #tpu.memory_space<vmem>>, vector<8x32xf32>
    %cst = arith.constant dense<0.000000e+00> : vector<8x128xf32>
    %8 = tpu.matmul %7, %4, %cst {dimension_numbers = #tpu.dot_dimension_numbers<[1], [1], [0], [0], [0, 0, 1, 0], [], []>} : vector<8x32xf32>, vector<128x32xf32>, vector<8x128xf32> -> vector<8x128xf32>
    %c0_i32_8 = arith.constant 0 : i32
    %9 = arith.cmpi slt, %arg2, %c0_i32_8 : i32
    %10 = arith.extui %9 : i1 to i32
    %c0_i32_9 = arith.constant 0 : i32
    %11 = arith.cmpi ne, %10, %c0_i32_9 : i32
    scf.if %11 {
      %c0_14 = arith.constant 0 : index
      %c0_15 = arith.constant 0 : index
      %18 = vector.load %arg8[%c0_14, %c0_15] : memref<8x1xf32, #tpu.memory_space<vmem>>, vector<8x1xf32>
      %cst_16 = arith.constant dense<0xFF800000> : vector<8xf32>
      %19 = vector.multi_reduction <maximumf>, %8, %cst_16 [1] : vector<8x128xf32> to vector<8xf32>
      %20 = vector.shape_cast %19 : vector<8xf32> to vector<8x1xf32>
      %21 = arith.maximumf %18, %20 : vector<8x1xf32>
      %22 = arith.subf %18, %21 : vector<8x1xf32>
      %23 = math.exp %22 : vector<8x1xf32>
      %24 = vector.broadcast %21 : vector<8x1xf32> to vector<8x128xf32>
      %25 = arith.subf %8, %24 : vector<8x128xf32>
      %26 = math.exp %25 : vector<8x128xf32>
      %c0_17 = arith.constant 0 : index
      %c0_18 = arith.constant 0 : index
      %27 = vector.load %arg9[%c0_17, %c0_18] : memref<8x1xf32, #tpu.memory_space<vmem>>, vector<8x1xf32>
      %28 = arith.mulf %23, %27 : vector<8x1xf32>
      %cst_19 = arith.constant dense<0.000000e+00> : vector<8xf32>
      %29 = vector.multi_reduction <add>, %26, %cst_19 [1] : vector<8x128xf32> to vector<8xf32>
      %30 = vector.shape_cast %29 : vector<8xf32> to vector<8x1xf32>
      %31 = arith.addf %28, %30 : vector<8x1xf32>
      %c0_20 = arith.constant 0 : index
      %c0_21 = arith.constant 0 : index
      %32 = vector.load %arg9[%c0_20, %c0_21] : memref<8x1xf32, #tpu.memory_space<vmem>>, vector<8x1xf32>
      tpu.vector_store %arg9[%c0_20, %c0_21], %31 {strides = array<i32>} : memref<8x1xf32, #tpu.memory_space<vmem>>, vector<8x1xf32>,
      %c0_22 = arith.constant 0 : index
      %c0_23 = arith.constant 0 : index
      %33 = vector.load %arg10[%c0_22, %c0_23] : memref<8x32xf32, #tpu.memory_space<vmem>>, vector<8x32xf32>
      %34 = vector.broadcast %23 : vector<8x1xf32> to vector<8x32xf32>
      %35 = arith.mulf %34, %33 : vector<8x32xf32>
      %cst_24 = arith.constant dense<0.000000e+00> : vector<8x32xf32>
      %36 = tpu.matmul %26, %6, %cst_24 {dimension_numbers = #tpu.dot_dimension_numbers<[1], [0], [0], [1], [0, 0, 1, 1], [], []>} : vector<8x128xf32>, vector<128x32xf32>, vector<8x32xf32> -> vector<8x32xf32>
      %37 = arith.addf %35, %36 : vector<8x32xf32>
      %c0_25 = arith.constant 0 : index
      %c0_26 = arith.constant 0 : index
      %38 = vector.load %arg10[%c0_25, %c0_26] : memref<8x32xf32, #tpu.memory_space<vmem>>, vector<8x32xf32>
      tpu.vector_store %arg10[%c0_25, %c0_26], %37 {strides = array<i32>} : memref<8x32xf32, #tpu.memory_space<vmem>>, vector<8x32xf32>,
      %c0_27 = arith.constant 0 : index
      %c0_28 = arith.constant 0 : index
      %39 = vector.load %arg8[%c0_27, %c0_28] : memref<8x1xf32, #tpu.memory_space<vmem>>, vector<8x1xf32>
      tpu.vector_store %arg8[%c0_27, %c0_28], %21 {strides = array<i32>} : memref<8x1xf32, #tpu.memory_space<vmem>>, vector<8x1xf32>,
    } else {
    }
    %c0_i32_10 = arith.constant 0 : i32
    %12 = arith.cmpi eq, %arg2, %c0_i32_10 : i32
    %13 = arith.extui %12 : i1 to i32
    %c0_i32_11 = arith.constant 0 : i32
    %14 = arith.cmpi ne, %13, %c0_i32_11 : i32
    scf.if %14 {
      %c128_i32 = arith.constant 128 : i32
      %18 = arith.muli %arg2, %c128_i32 : i32
      %19 = tpu.iota {dimensions = array<i32: 1>} : vector<8x128xi32>
      %20 = vector.broadcast %18 : i32 to vector<8x128xi32>
      %21 = arith.addi %20, %19 : vector<8x128xi32>
      %c8_i32 = arith.constant 8 : i32
      %22 = vector.broadcast %c8_i32 : i32 to vector<8x128xi32>
      %23 = arith.cmpi slt, %21, %22 : vector<8x128xi32>
      %cst_14 = arith.constant 0xFF800000 : f32
      %24 = vector.broadcast %cst_14 : f32 to vector<8x128xf32>
      %25 = arith.select %23, %8, %24 : vector<8x128xi1>, vector<8x128xf32>
      %c128_i32_15 = arith.constant 128 : i32
      %26 = arith.muli %arg2, %c128_i32_15 : i32
      %27 = tpu.iota {dimensions = array<i32: 0>} : vector<128x32xi32>
      %28 = vector.broadcast %26 : i32 to vector<128x32xi32>
      %29 = arith.addi %28, %27 : vector<128x32xi32>
      %c8_i32_16 = arith.constant 8 : i32
      %30 = vector.broadcast %c8_i32_16 : i32 to vector<128x32xi32>
      %31 = arith.cmpi slt, %29, %30 : vector<128x32xi32>
      %cst_17 = arith.constant 0.000000e+00 : f32
      %32 = vector.broadcast %cst_17 : f32 to vector<128x32xf32>
      %33 = arith.select %31, %6, %32 : vector<128x32xi1>, vector<128x32xf32>
      %c0_18 = arith.constant 0 : index
      %c0_19 = arith.constant 0 : index
      %34 = vector.load %arg8[%c0_18, %c0_19] : memref<8x1xf32, #tpu.memory_space<vmem>>, vector<8x1xf32>
      %cst_20 = arith.constant dense<0xFF800000> : vector<8xf32>
      %35 = vector.multi_reduction <maximumf>, %25, %cst_20 [1] : vector<8x128xf32> to vector<8xf32>
      %36 = vector.shape_cast %35 : vector<8xf32> to vector<8x1xf32>
      %37 = arith.maximumf %34, %36 : vector<8x1xf32>
      %38 = arith.subf %34, %37 : vector<8x1xf32>
      %39 = math.exp %38 : vector<8x1xf32>
      %40 = vector.broadcast %37 : vector<8x1xf32> to vector<8x128xf32>
      %41 = arith.subf %25, %40 : vector<8x128xf32>
      %42 = math.exp %41 : vector<8x128xf32>
      %c0_21 = arith.constant 0 : index
      %c0_22 = arith.constant 0 : index
      %43 = vector.load %arg9[%c0_21, %c0_22] : memref<8x1xf32, #tpu.memory_space<vmem>>, vector<8x1xf32>
      %44 = arith.mulf %39, %43 : vector<8x1xf32>
      %cst_23 = arith.constant dense<0.000000e+00> : vector<8xf32>
      %45 = vector.multi_reduction <add>, %42, %cst_23 [1] : vector<8x128xf32> to vector<8xf32>
      %46 = vector.shape_cast %45 : vector<8xf32> to vector<8x1xf32>
      %47 = arith.addf %44, %46 : vector<8x1xf32>
      %c0_24 = arith.constant 0 : index
      %c0_25 = arith.constant 0 : index
      %48 = vector.load %arg9[%c0_24, %c0_25] : memref<8x1xf32, #tpu.memory_space<vmem>>, vector<8x1xf32>
      tpu.vector_store %arg9[%c0_24, %c0_25], %47 {strides = array<i32>} : memref<8x1xf32, #tpu.memory_space<vmem>>, vector<8x1xf32>,
      %c0_26 = arith.constant 0 : index
      %c0_27 = arith.constant 0 : index
      %49 = vector.load %arg10[%c0_26, %c0_27] : memref<8x32xf32, #tpu.memory_space<vmem>>, vector<8x32xf32>
      %50 = vector.broadcast %39 : vector<8x1xf32> to vector<8x32xf32>
      %51 = arith.mulf %50, %49 : vector<8x32xf32>
      %cst_28 = arith.constant dense<0.000000e+00> : vector<8x32xf32>
      %52 = tpu.matmul %42, %33, %cst_28 {dimension_numbers = #tpu.dot_dimension_numbers<[1], [0], [0], [1], [0, 0, 1, 1], [], []>} : vector<8x128xf32>, vector<128x32xf32>, vector<8x32xf32> -> vector<8x32xf32>
      %53 = arith.addf %51, %52 : vector<8x32xf32>
      %c0_29 = arith.constant 0 : index
      %c0_30 = arith.constant 0 : index
      %54 = vector.load %arg10[%c0_29, %c0_30] : memref<8x32xf32, #tpu.memory_space<vmem>>, vector<8x32xf32>
      tpu.vector_store %arg10[%c0_29, %c0_30], %53 {strides = array<i32>} : memref<8x32xf32, #tpu.memory_space<vmem>>, vector<8x32xf32>,
      %c0_31 = arith.constant 0 : index
      %c0_32 = arith.constant 0 : index
      %55 = vector.load %arg8[%c0_31, %c0_32] : memref<8x1xf32, #tpu.memory_space<vmem>>, vector<8x1xf32>
      tpu.vector_store %arg8[%c0_31, %c0_32], %37 {strides = array<i32>} : memref<8x1xf32, #tpu.memory_space<vmem>>, vector<8x1xf32>,
    } else {
    }
    %c0_i32_12 = arith.constant 0 : i32
    %15 = arith.cmpi eq, %arg2, %c0_i32_12 : i32
    %16 = arith.extui %15 : i1 to i32
    %c0_i32_13 = arith.constant 0 : i32
    %17 = arith.cmpi ne, %16, %c0_i32_13 : i32
    scf.if %17 {
      %c0_14 = arith.constant 0 : index
      %c0_15 = arith.constant 0 : index
      %18 = vector.load %arg9[%c0_14, %c0_15] : memref<8x1xf32, #tpu.memory_space<vmem>>, vector<8x1xf32>
      %19 = tpu.reciprocal %18 : vector<8x1xf32> -> vector<8x1xf32>
      %c0_16 = arith.constant 0 : index
      %c0_17 = arith.constant 0 : index
      %20 = vector.load %arg10[%c0_16, %c0_17] : memref<8x32xf32, #tpu.memory_space<vmem>>, vector<8x32xf32>
      %21 = vector.broadcast %19 : vector<8x1xf32> to vector<8x32xf32>
      %22 = arith.mulf %20, %21 : vector<8x32xf32>
      %c0_18 = arith.constant 0 : index
      %c0_19 = arith.constant 0 : index
      %c0_20 = arith.constant 0 : index
      %23 = vector.load %arg6[%c0_18, %c0_19, %c0_20] : memref<1x8x32xf32, #tpu.memory_space<vmem>>, vector<1x8x32xf32>
      %24 = vector.shape_cast %23 : vector<1x8x32xf32> to vector<8x32xf32>
      %25 = vector.shape_cast %22 : vector<8x32xf32> to vector<1x8x32xf32>
      tpu.vector_store %arg6[%c0_18, %c0_19, %c0_20], %25 {strides = array<i32>} : memref<1x8x32xf32, #tpu.memory_space<vmem>>, vector<1x8x32xf32>,
    } else {
    }
    return
  }
  func.func @transform_0(%arg0: i32, %arg1: i32, %arg2: i32) -> (i32, i32, i32) {
    %c0_i32 = arith.constant 0 : i32
    %c0_i32_0 = arith.constant 0 : i32
    return %arg0, %arg1, %c0_i32 : i32, i32, i32
  }
  func.func @transform_1(%arg0: i32, %arg1: i32, %arg2: i32) -> (i32, i32, i32) {
    %c0_i32 = arith.constant 0 : i32
    %c0_i32_0 = arith.constant 0 : i32
    return %arg0, %arg2, %c0_i32 : i32, i32, i32
  }
  func.func @transform_2(%arg0: i32, %arg1: i32, %arg2: i32) -> (i32, i32, i32) {
    %c0_i32 = arith.constant 0 : i32
    %c0_i32_0 = arith.constant 0 : i32
    return %arg0, %arg2, %c0_i32 : i32, i32, i32
  }
  func.func @transform_3(%arg0: i32, %arg1: i32, %arg2: i32) -> (i32, i32, i32) {
    %c0_i32 = arith.constant 0 : i32
    %c0_i32_0 = arith.constant 0 : i32
    return %arg0, %arg1, %c0_i32 : i32, i32, i32
  }
}

</mosaic_0001>

<bundles_post_ra>
// kernel: tpu_custom_call.1
= control target key start
LH: loop header
LB: loop body
LE: loop exit
PB: predicated region body
PF: predicated region fallthrough
CT: control target
= control target key end

     0   :  { %s1292_s0 = inlined_call_operand.hbm [shape: f32[2,8,32], index: 0, kind: input, shape index: {}]   ;;  %s1293_s1 = inlined_call_operand.hbm [shape: f32[2,8,32], index: 1, kind: input, shape index: {}]   ;;  %s1294_s2 = inlined_call_operand.hbm [shape: f32[2,8,32], index: 2, kind: input, shape index: {}]   ;;  %s1295_s3 = inlined_call_operand.hbm [shape: f32[2,8,32], index: 3, kind: output, shape index: {}]  }
   0x1   :  { %1296 = sst [smem:[#allocation16_spill]] %s1292_s0 }
   0x2   :  { %1297 = sst [smem:[#allocation17_spill]] %s1293_s1 }
   0x3   :  { %8 = vsyncpa [#allocation7], 0 }
   0x4   :  { %10 = vsyncpa [#allocation7 + $0x1], 0 }
   0x5   :  { %11 = vsyncpa [#allocation10], 0 }
   0x6   :  { %13 = vsyncpa [#allocation10 + $0x1], 0 }
   0x7   :  { %14 = vsyncpa [#allocation8], 0 }
   0x8   :  { %16 = vsyncpa [#allocation8 + $0x1], 0  ;;  %s1087_s12 = smov 0   ;;  %s1089_s13 = smov 0  }
   0x9   :  { %s1091_s14 = smov 0   ;;  %s1093_s15 = smov 0  }
   0xa   :  { %s1095_s16 = smov 0   ;;  %s1097_s17 = smov 0  }
   0xb LB: > { %s1118_s18 = sadd.s32 4294967295, %s1058_s17   ;;  %s786_s19 = sadd.s32 4294967294, %s1058_s17   ;;  %s1058_s17 = sphi %s1097_s17, %s22_s17   ;;  %s1054_s16 = sphi %s1095_s16, %s1308_s16   ;;  %s1050_s15 = sphi %s1093_s15, %s1307_s15   ;;  %s1046_s14 = sphi %s1091_s14, %s1306_s14   ;;  %s1042_s13 = sphi %s1089_s13, %s1305_s13   ;;  %s1038_s12 = sphi %s1087_s12, %s1304_s12  }
   0xc   : > { %s41_s20 = sadd.s32 1, %s1054_s16  ;;  %s50_s21 = sadd.s32 1, %s1046_s14 }
   0xd   : > { %p43_p0 = scmp.ge.s32.totalorder %s41_s20, 2  ;;  %p57_p1 = scmp.ne.s32.totalorder %s1046_s14, %s1042_s13 }
   0xe   : > { %p58_p2 = scmp.eq.s32.totalorder %s1058_s17, 0  ;;  %p63_p3 = scmp.ne.s32.totalorder %s1042_s13, %s1038_s12 }
   0xf   : > { %s1310_s20 = smov (%p43_p0, %s41_s20), 0  ;;  %p64_p5 = scmp.eq.s32.totalorder %s1118_s18, 0 }
  0x10   : > { %p1130_p4 = por %p58_p2, %p57_p1  ;;  %s45_s23 = ssub.s32 %s1054_s16, %s1310_s20 }
  0x11   : > { %p145_p6 = scmp.eq.s32.totalorder %s1118_s18, 1  ;;  %p48_p7 = scmp.eq.s32.totalorder %s45_s23, 0 }
  0x12   : > { %p1138_p8 = por %p64_p5, %p63_p3  ;;  %p151_p10 = scmp.eq.s32.totalorder %s786_s19, 1 }
  0x13   : > { %p1142_p9 = por %p145_p6, %p57_p1  ;;  %p788_p12 = scmp.ge.s32.totalorder %s1058_s17, 2 }
  0x14   : > { %s1147_s26 = scalar_select %p48_p7, %s1046_s14, %s50_s21  }
  0x15   : > { %p1149_p11 = por %p151_p10, %p63_p3  ;;  %167 = sbr.rel (%p788_p12) target bundleno = 50 (0x32), region = 16 }
  0x16   : > { %s1157_s28 = sand.u32 (!%p788_p12), 1, %s1046_s14   ;;  %s1160_s29 = sshll.u32 (!%p788_p12), %s1054_s16, 3 }
  0x17   : > { %s789_s30 = sshll.u32 (!%p788_p12), %s1157_s28, 3  ;;  %s1302_s0 = sld [smem:[#allocation16_spill]] (!%p788_p12) }
  0x18   : > { %s175_s8 = scalar_lea.vmem (!%p788_p12), [#allocation6], %s789_s30  ;;  %s172_s10 = scalar_lea.sflag (!%p788_p12), [#allocation7], %s1157_s28 }
  0x19   : > { %s184_s9 = sshll.u32 (!%p788_p12), %s175_s8, 4  ;;  %s185_s9 = int_to_ptr.vmem [resolvable:$true] %s184_s9 }
  0x1a   : > { %s191_s11 = sand.u32 (%p1130_p4), 1, %s1058_s17   ;;  %s791_s19 = sshll.u32 (%p1130_p4), %s1157_s28, 7 }
  0x1b   : > { %190 = sbr.rel (!%p1130_p4) target bundleno = 41 (0x29), region = 24  ;;  %s192_s21 = scalar_lea.sflag (%p1130_p4), [#allocation10], %s191_s11 }
  0x1c   : > { %s195_s23 = scalar_lea.vmem (%p1130_p4), [#allocation9], %s791_s19 }
  0x1d   : > { %s180_s6 = scalar_lea.hbm %s1302_s0, %s1160_s29 }
  0x1e   : > { %s182_s7 = sshll.u32 %s180_s6, 4  ;;  %s183_s7 = int_to_ptr.hbm [resolvable:$true] %s182_s7 }
  0x1f   : > { %821 = dma.hbm_to_vmem [thread:$0]  (%p1130_p4), %s183_s7, 128, %s185_s9, %s172_s10  }
  0x20   : > { %201 = vsyncadd %s192_s21, 1920  ;;  %s1303_s1 = sld [smem:[#allocation17_spill]]  ;;  %s209_s6 = sshll.u32 %s195_s23, 4  ;;  %s210_s6 = int_to_ptr.vmem [resolvable:$true] %s209_s6 }
  0x21   : > { %s1060_s7 = smov 128   ;;  %s1061_s9 = smov 8  }
  0x26   : > { %s205_s30 = scalar_lea.hbm %s1303_s1, %s1160_s29 }
  0x27   : > { %s207_s8 = sshll.u32 %s205_s30, 4  ;;  %s208_s8 = int_to_ptr.hbm [resolvable:$true] %s207_s8 }
  0x28   : > { %215 = dma.hbm_to_vmem [thread:$0]  %s208_s8, 128, %s210_s6, %s192_s21, %s1060_s7, %s1060_s7, %s1061_s9  }
  0x29 PF: > { %218 = sbr.rel (!%p1130_p4) target bundleno = 50 (0x32), region = 28  ;;  %s219_s10 = sand.u32 (%p1130_p4), 1, %s1058_s17  }
  0x2a   : > { %s793_s11 = sshll.u32 (%p1130_p4), %s1157_s28, 7  ;;  %s220_s19 = scalar_lea.sflag (%p1130_p4), [#allocation10], %s219_s10 }
  0x2b   : > { %s223_s0 = scalar_lea.vmem (%p1130_p4), [#allocation11], %s793_s11 }
  0x2e   : > { %229 = vsyncadd %s220_s19, 1920  ;;  %s233_s5 = scalar_lea.hbm %s1294_s2, %s1160_s29  ;;  %s237_s30 = sshll.u32 %s223_s0, 4  ;;  %s238_s30 = int_to_ptr.vmem [resolvable:$true] %s237_s30 }
  0x2f   : > { %s235_s1 = sshll.u32 %s233_s5, 4  ;;  %s1062_s21 = smov 128   ;;  %s236_s1 = int_to_ptr.hbm [resolvable:$true] %s235_s1 }
  0x30   : > { %s1063_s6 = smov 8  }
  0x31   : > { %243 = dma.hbm_to_vmem [thread:$0]  %s236_s1, 128, %s238_s30, %s220_s19, %s1062_s21, %s1062_s21, %s1063_s6  }
  0x32 PF: > { %p795_p13 = scmp.ge.s32.totalorder %s1058_s17, 1  ;;  %p245_p0 = scmp.lt.s32.totalorder %s1058_s17, 3 }
  0x34   : > { %p246_p1 = pnand %p795_p13, %p245_p0 }
  0x35   : > { %s1189_s22 = sand.u32 (!%p246_p1), 1, %s1042_s13  }
  0x36   : > { %249 = sbr.rel (%p246_p1) target bundleno = 737 (0x2e1), region = 32  ;;  %s796_s0 = sshll.u32 (!%p246_p1), %s1189_s22, 3 }
  0x37   : > { %s252_s28 = scalar_lea.sflag (!%p246_p1), [#allocation7], %s1189_s22  ;;  %s255_s29 = scalar_lea.vmem (!%p246_p1), [#allocation6], %s796_s0 }
  0x3b   : > { %1025 = dma.done.wait (%p1138_p8), %s252_s28, 128  }
  0x3c   : > { %1027 = vsyncadd (%p1138_p8), %s252_s28, 4294967168  ;;  %s261_s1 = sand.u32 1, %s1118_s18   ;;  %s797_s8 = sshll.u32 %s1189_s22, 7 }
  0x3d   : > { %s262_s7 = scalar_lea.sflag [#allocation10], %s261_s1  ;;  %s1203_s9 = scalar_lea.vmem [#allocation9], %s797_s8 }
  0x3e   : > { %1029 = dma.done.wait (%p1138_p8), %s262_s7, 4096  }
  0x3f   : > { %1031 = vsyncadd (%p1138_p8), %s262_s7, 4294963200  ;;  %vm322_vm0 = vcmask 261120   ;;  %v342_v0 = vld [vmem:[%s1203_s9 + $0x78] sm:$0xff]  ;;  %v341_v1 = vld [vmem:[%s1203_s9 + $0x70] sm:$0xff]  ;;  %vm319_vm1 = vcmask 7168   ;;  %v1064_v19 = vmov -inf   ;;  %v492_v20 = vlaneseq }
  0x40   : > { %800 = vmatpush.xpose.msk.msra.mxu0 %vm322_vm0, %v342_v0  ;;  %v340_v2 = vld [vmem:[%s1203_s9 + $0x68] sm:$0xff]  ;;  %v339_v3 = vld [vmem:[%s1203_s9 + $0x60] sm:$0xff]  ;;  %v338_v4 = vld [vmem:[%s1203_s9 + $0x58] sm:$0xff]  ;;  %320 = vst.msk [vmem:[#allocation3] sm:$0xff] %vm319_vm1, %v1064_v19  ;;  %v1065_v24 = vmov 0   ;;  %v1066_v25 = vmov 0.0  }
  0x41   : > { %v337_v5 = vld [vmem:[%s1203_s9 + $0x50] sm:$0xff]  ;;  %v336_v7 = vld [vmem:[%s1203_s9 + $0x48] sm:$0xff]  ;;  %v335_v9 = vld [vmem:[%s1203_s9 + $0x40] sm:$0xff]  ;;  %v493_v21 = vand.u32 127, %v492_v20  ;;  %887 = vset.pattern.permute.xlu0 %v1065_v24  ;;  %888 = vset.pattern.permute.xlu1 %v1065_v24  ;;  %321 = vst.msk [vmem:[#allocation4] sm:$0xff] %vm319_vm1, %v1066_v25  ;;  %s275_s18 = scalar_lea.vmem [#allocation11], %s797_s8 }
  0x42   : > { %v324_v6 = vld [vmem:[%s255_s29] sm:$0xff]  ;;  %v332_v12 = vld [vmem:[%s1203_s9 + $0x28] sm:$0xff]  ;;  %v331_v13 = vld [vmem:[%s1203_s9 + $0x20] sm:$0xff]  ;;  %889 = vset.pattern.permute.xlu2 %v1065_v24  ;;  %323 = vst.msk [vmem:[#allocation5] sm:$0xff] %vm322_vm0, %v1066_v25  ;;  %s818_s24 = sshll.u32 %s1050_s15, 3  ;;  %s308_s4 = scalar_lea.vmem [#allocation12], %s796_s0 }
  0x43   : > { %v325_v8 = vmul.f32 0.17677669, %v324_v6  ;;  %v334_v10 = vld [vmem:[%s1203_s9 + $0x38] sm:$0xff]  ;;  %v333_v11 = vld [vmem:[%s1203_s9 + $0x30] sm:$0xff]  ;;  %v328_v16 = vld [vmem:[%s1203_s9 + $0x8] sm:$0xff]  ;;  %vm496_vm2 = vcmp.lt.s32.totalorder %v493_v21, 8  ;;  %s650_s19 = scalar_lea.hbm %s1295_s3, %s818_s24 }
  0x44   : > { %801 = vmatpush.xpose.msk.msra.mxu0 %vm322_vm0, %v341_v1  ;;  %v330_v14 = vld [vmem:[%s1203_s9 + $0x18] sm:$0xff]  ;;  %v329_v15 = vld [vmem:[%s1203_s9 + $0x10] sm:$0xff]  ;;  %v327_v17 = vld [vmem:[%s1203_s9] sm:$0xff]  ;;  %s652_s23 = sshll.u32 %s308_s4, 4  ;;  %s654_s5 = sshll.u32 %s650_s19, 4  ;;  %s653_s23 = int_to_ptr.vmem [resolvable:$true] %s652_s23  ;;  %s655_s5 = int_to_ptr.hbm [resolvable:$true] %s654_s5 }
  0x45   : > { %326 = vst.msk [vmem:[#allocation2] sm:$0xff] %vm322_vm0, %v325_v8  ;;  %v343_v30 = vld [vmem:[%s275_s18] sm:$0xff]  ;;  %s639_s30 = scalar_lea.sflag [#allocation8], %s1189_s22  ;;  %s986_s21 = sshra.s32 %s655_s5, 4  ;;  %s987_s21 = int_to_ptr.hbm [resolvable:$true] %s986_s21 }
  0x46   : > { %607 = vmatpush.msra.mxu1 %v343_v30  ;;  %s988_s15 = scalar_lea.hbm %s987_s21, 8  ;;  %s992_s0 = scalar_lea.hbm %s1295_s3, 16 }
  0x47   : > { %v563_v26 = vld [vmem:[#allocation3] sm:$0xff]  ;;  %p989_p2 = scmp.ne.s32.totalorder %s987_s21, %s988_s15  ;;  %p993_p5 = scmp.lt.s32.totalorder %s987_s21, %s1295_s3 }
  0x48   : > { %802 = vmatpush.xpose.msk.msra.mxu0 %vm322_vm0, %v340_v2  ;;  %v578_v37 = vld [vmem:[#allocation4] sm:$0xff]  ;;  %p994_p6 = scmp.lt.s32.totalorder %s992_s0, %s988_s15 }
  0x49   : > { %v585_v46 = vld [vmem:[#allocation5] sm:$0xff]  ;;  %p990_p3 = pnand %p989_p2, %p1142_p9 }
  0x4a   : > { %p995_p7 = por %p994_p6, %p993_p5 }
  0x4b   : > { %p991_p4 = pneg %p990_p3 }
  0x4c   : > { %803 = vmatpush.xpose.msk.msra.mxu0 %vm322_vm0, %v339_v3  ;;  %v359_v18 = vld [vmem:[#allocation2] sm:$0xff] }
  0x4d   : > { %p996_p8 = pnand %p995_p7, %p991_p4 }
  0x50   : > { %804 = vmatpush.xpose.msk.msra.mxu0 %vm322_vm0, %v338_v4 }
  0x54   : > { %805 = vmatpush.xpose.msk.msra.mxu0 %vm322_vm0, %v337_v5 }
  0x58   : > { %806 = vmatpush.xpose.msk.msra.mxu0 %vm322_vm0, %v336_v7 }
  0x5c   : > { %807 = vmatpush.xpose.msk.msra.mxu0 %vm322_vm0, %v335_v9 }
  0x60   : > { %808 = vmatpush.xpose.msk.msra.mxu0 %vm322_vm0, %v334_v10 }
  0x64   : > { %809 = vmatpush.xpose.msk.msra.mxu0 %vm322_vm0, %v333_v11 }
  0x68   : > { %810 = vmatpush.xpose.msk.msra.mxu0 %vm322_vm0, %v332_v12 }
  0x6c   : > { %811 = vmatpush.xpose.msk.msra.mxu0 %vm322_vm0, %v331_v13 }
  0x70   : > { %812 = vmatpush.xpose.msk.msra.mxu0 %vm322_vm0, %v330_v14 }
  0x74   : > { %813 = vmatpush.xpose.msk.msra.mxu0 %vm322_vm0, %v329_v15 }
  0x78   : > { %814 = vmatpush.xpose.msk.msra.mxu0 %vm322_vm0, %v328_v16 }
  0x7c   : > { %815 = vmatpush.xpose.msk.msra.mxu0 %vm322_vm0, %v327_v17 }
  0x7f   : > { %816 = vmatmul.msk.f32.vlgmr.msra.gmra.mxu0 %vm322_vm0, %v359_v18 }
  0xfc   : > { %v429_v22 = vpop.f32.mrf.mxu0 }
  0xfd   : > { %v497_v23 = vsel %vm496_vm2, %v429_v22, -inf }
  0xfe   : > { %564 = vmax.xlane.f32.xlu0 %v497_v23 }
 0x171   : > { %v565_v27 = vpop.xlane.xlu0 %564 }
 0x172   : > { %v566_v28 = vmax.f32 %v563_v26, %v565_v27 }
 0x174   : > { %v567_v29 = vsub.f32 %v563_v26, %v566_v28  ;;  %614 = vst.msk [vmem:[#allocation3] sm:$0xff] %vm319_vm1, %v566_v28  ;;  %572 = vperm.xlu0 %887, %v566_v28  }
 0x176   : > { %v568_v35 = vmul.f32 1.442695, %v567_v29 }
 0x1e6   : > { %v573_v31 = vpop.permute.xlu0 %572 }
 0x1e7   : > { %v575_v32 = vsub.f32 %v497_v23, %v573_v31 }
 0x1e9   : > { %v576_v33 = vmul.f32 1.442695, %v575_v32 }
 0x1eb   : > { %890 = vpow2.f32 %v576_v33 }
 0x1ec   : > { %892 = vpow2.f32 %v568_v35 }
 0x1f1   : > { %v891_v34 = vpop.eup %890 }
 0x1f2   : > { %580 = vadd.xlane.f32.xlu1 %v891_v34  ;;  %608 = vmatmul.f32.vlgmr.msra.gmra.mxu1 %v891_v34  ;;  %v893_v36 = vpop.eup %892 }
 0x1f3   : > { %v579_v38 = vmul.f32 %v893_v36, %v578_v37 }
 0x20b   : > { %588 = vperm.xlu1 %888, %v893_v36  }
 0x265   : > { %v581_v39 = vpop.xlane.xlu1 %580 }
 0x266   : > { %v582_v40 = vadd.f32 %v581_v39, %v579_v38 }
 0x268   : > { %584 = vst.msk [vmem:[#allocation4] sm:$0xff] %vm319_vm1, %v582_v40 }
 0x26f   : > { %v615_v41 = vld [vmem:[#allocation4] sm:$0xff]  ;;  %v609_v53 = vpop.f32.mrf.mxu1 }
 0x270   : > { %894 = vrcp.f32 %v615_v41  ;;  %v627_v45 = vand.u32 2147483648, %v615_v41  ;;  %v625_v48 = vand.u32 2147483647, %v615_v41  ;;  %vm621_vm4 = vweird.f32 %v615_v41 }
 0x272   : > { %v628_v52 = vor.u32 1.1754944e-38, %v627_v45  ;;  %vm626_vm6 = vcmp.eq.f32.partialorder %v625_v48, 8.507059e+37 }
 0x276   : > { %v895_v42 = vpop.eup %894 }
 0x277   : > { %v617_v43 = vmul.f32 %v895_v42, %v615_v41  ;;  %vm622_vm3 = vweird.f32 %v895_v42 }
 0x278   : > { %vm623_vm5 = vmor %vm621_vm4, %vm622_vm3 }
 0x279   : > { %v618_v44 = vsub.f32 1.0, %v617_v43 }
 0x27b   : > { %v619_v47 = vmul.f32 %v895_v42, %v618_v44 }
 0x27d   : > { %v589_v49 = vpop.permute.xlu1 %588  ;;  %v620_v50 = vadd.f32 %v895_v42, %v619_v47 }
 0x27e   : > { %v591_v51 = vmul.f32 %v589_v49, %v585_v46 }
 0x27f   : > { %v624_v54 = vsel %vm623_vm5, %v895_v42, %v620_v50 }
 0x280   : > { %v612_v55 = vadd.f32 %v609_v53, %v591_v51  ;;  %v629_v56 = vsel %vm626_vm6, %v628_v52, %v624_v54 }
 0x281   : > { %633 = vperm.xlu2 %889, %v629_v56  }
 0x282   : > { %613 = vst.msk [vmem:[#allocation5] sm:$0xff] %vm322_vm0, %v612_v55 }
 0x289   : > { %v630_v57 = vld [vmem:[#allocation5] sm:$0xff] }
 0x2db   : > { %v634_v58 = vpop.permute.xlu2 %633 }
 0x2dc   : > { %v636_v59 = vmul.f32 %v634_v58, %v630_v57 }
 0x2de   : > { %637 = vst.msk [vmem:[%s308_s4] sm:$0xff] %vm322_vm0, %v636_v59 }
 0x2df   : > { %999 = shalt.err (!%p996_p8)
}
 0x2e0   : > { %825 = dma.vmem_to_hbm [thread:$0]  (%p1142_p9), %s653_s23, 128, %s655_s5, %s639_s30  }
 0x2e1 PF: > { %s666_s22 = sand.u32 1, %s1038_s12   ;;  %p828_p10 = pnand %p788_p12, %p1149_p11 }
 0x2e2   : > { %s667_s8 = scalar_lea.sflag [#allocation8], %s666_s22 }
 0x2e3   : > { %p829_p13 = pneg %p828_p10 }
 0x2e5   : > { %1033 = dma.done.wait (%p829_p13), %s667_s8, 128  }
 0x2e6   : > { %1035 = vsyncadd (%p829_p13), %s667_s8, 4294967168  ;;  %s22_s17 = sadd.s32 1, %s1058_s17   ;;  %s1304_s12 = smov %s1042_s13 }
 0x2e7   : > { %p19_p0 = scmp.ge.s32.totalorder %s22_s17, 4   ;;  %s1305_s13 = smov %s1046_s14 }
 0x2e8   : > { %s1306_s14 = smov %s1147_s26  ;;  %s1307_s15 = smov %s1054_s16 }
 0x2e9   : > { %s1308_s16 = smov %s1310_s20  ;;  %21 = sbr.rel (!%p19_p0) target bundleno = 11 (0xb), region = 113 }
 0x2ee   :  { %673 = vsyncpa [#allocation7], 1 }
 0x2ef   :  { %675 = vsyncpa [#allocation7 + $0x1], 1 }
 0x2f0   :  { %676 = vsyncpa [#allocation10], 1 }
 0x2f1   :  { %678 = vsyncpa [#allocation10 + $0x1], 1 }
 0x2f2   :  { %679 = vsyncpa [#allocation8], 1 }
 0x2f3   :  { %681 = vsyncpa [#allocation8 + $0x1], 1 }

</bundles_post_ra>
